<compile_context>
chip_gen: v7x
topology: tpu7x:2x2x1
jax: 0.10.0
libtpu: 0.0.40
codegen_flags: <defaults>
</compile_context>

<pallas_src>
import jax
import jax.numpy as jnp
from jax import lax
from jax.experimental import pallas as pl
from jax.experimental.pallas import tpu as pltpu


def _round_up(v, m):
    return -(-int(v) // int(m)) * int(m)


def _device_profile():
    """(target_tile_bytes, vmem_cap_bytes, two_cores) for the local TPU gen."""
    kind = ""
    try:
        kind = jax.devices()[0].device_kind.lower()
    except Exception:
        pass
    vmem = None
    try:
        vmem = int(pltpu.get_tpu_info().vmem_capacity_bytes)
    except Exception:
        vmem = None
    if vmem is None:
        vmem = (64 << 20) if "v7" in kind else (128 << 20)
    v7x_class = (vmem <= (80 << 20)) or ("v7" in kind)
    if v7x_class:
        # 64 MiB VMEM, 2 TensorCores, ~3.2 TB/s HBM: bigger tiles amortise the
        # per-grid-step overhead; cap scoped VMEM well below 64 MiB physical.
        return 6 << 20, 44 << 20, True
    # v5e / v6e: 128 MiB VMEM, 1 TensorCore.
    return 4 << 20, 100 << 20, False


def _choose_tiles(N, C, HW, itemsize, target_bytes, two_cores):
    """Pick (bN, TC, THW) honouring the (sublane, 128) layout granules.

    All budgets are computed against the PADDED tile footprint (lanes rounded
    to 128, sublanes to 8/16/32 by dtype) so the real VMEM buffers stay close
    to `target_bytes`.
    """
    budget = max(1, target_bytes // itemsize)      # padded elements per tile
    sub_g = 8 * max(1, 4 // itemsize)              # sublane granule (rows)

    c_tileable = (C > sub_g) and (C % sub_g == 0)
    min_tc_pad = sub_g if c_tileable else _round_up(C, sub_g)

    # ---- spatial (lane) tile -------------------------------------------------
    lane_budget = max(128, budget // min_tc_pad)
    if HW <= lane_budget:
        thw = HW
    else:
        thw = max(128, (lane_budget // 128) * 128)
        for t in range(thw, 127, -128):            # prefer a divisor -> no tail mask
            if HW % t == 0:
                thw = t
                break
    thw_pad = _round_up(thw, 128)

    # ---- channel (sublane) tile ------------------------------------------------
    c_budget = max(1, budget // thw_pad)
    if (not c_tileable) or C <= c_budget:
        tc = C
    else:
        tc = sub_g
        start = (min(c_budget, C) // sub_g) * sub_g
        for t in range(start, sub_g - 1, -sub_g):  # divisor of C, multiple of granule
            if C % t == 0:
                tc = t
                break
    tc_pad = _round_up(tc, sub_g)

    # ---- batch tile: amortise per-grid-step overhead for small feature maps ----
    bn = 1
    if tc == C and thw == HW:
        bn = int(max(1, min(N, budget // max(1, tc_pad * thw_pad))))
        if two_cores and bn >= N and N >= 2:
            # Keep >= 2 blocks on a parallel axis so both TensorCores get work.
            bn = -(-N // 2)
    return bn, tc, thw


def _make_kernel(hw_total, thw, need_mask):
    scale = 0.5 / float(hw_total)

    def _accumulate(x_sum, x_max, sum_acc, max_acc):
        # f32 sum accumulation; per-tile max reduced then combined in f32.
        # TODO(synk): if VALU ever binds for bf16 on v7x, offload the running
        # sum to the idle MXU via jnp.dot(x, ones(thw)) instead.
        sum_acc[...] += jnp.sum(x_sum, axis=-1, dtype=jnp.float32)
        max_acc[...] = jnp.maximum(
            max_acc[...], jnp.max(x_max, axis=-1).astype(jnp.float32))

    def kernel(x_ref, o_ref, sum_acc, max_acc):
        hw_i = pl.program_id(2)
        last = pl.num_programs(2) - 1

        @pl.when(hw_i == 0)
        def _init():
            sum_acc[...] = jnp.zeros(sum_acc.shape, dtype=sum_acc.dtype)
            max_acc[...] = jnp.full(max_acc.shape, -jnp.inf, dtype=max_acc.dtype)

        x = x_ref[...]                     # (bN, TC, THW), native dtype
        if x.dtype != jnp.float32:
            x = x.astype(jnp.float32)      # widen once; feeds both reductions

        if need_mask:
            # Steady-state steps: no masking work at all.
            @pl.when(hw_i != last)
            def _bulk():
                _accumulate(x, x, sum_acc, max_acc)

            # Only the final HW step pays for the tail mask.
            @pl.when(hw_i == last)
            def _tail():
                pos = hw_i * thw + lax.broadcasted_iota(jnp.int32, x.shape, 2)
                valid = pos < hw_total
                xs = jnp.where(valid, x, jnp.zeros_like(x))
                xm = jnp.where(valid, x, jnp.full_like(x, -jnp.inf))
                _accumulate(xs, xm, sum_acc, max_acc)
        else:
            _accumulate(x, x, sum_acc, max_acc)

        @pl.when(hw_i == last)
        def _finalize():
            res = scale * sum_acc[...] + 0.5 * max_acc[...]
            o_ref[...] = res.astype(o_ref.dtype).reshape(o_ref.shape)

    return kernel


def fast_adaptive_avg_max_pool(x, flatten: bool = False, *, _target_tile_bytes=None):
    """x: (N, C, H, W) floating-point array (NCHW, matching the PyTorch module)."""
    if not jnp.issubdtype(x.dtype, jnp.floating):
        raise TypeError(
            f"fast_adaptive_avg_max_pool expects a floating dtype, got {x.dtype}")

    N, C, H, W = x.shape
    HW = H * W
    x3 = x.reshape(N, C, HW)
    itemsize = jnp.dtype(x.dtype).itemsize

    target_tile_bytes, vmem_cap, two_cores = _device_profile()
    if _target_tile_bytes is not None:
        target_tile_bytes = int(_target_tile_bytes)

    bn, tc, thw = _choose_tiles(N, C, HW, itemsize, target_tile_bytes, two_cores)
    nb = -(-N // bn)
    cb = C // tc                       # tc always divides C (or equals it)
    hb = -(-HW // thw)
    need_mask = (HW % thw) != 0

    kernel = _make_kernel(HW, thw, need_mask)

    # Scoped-VMEM budget from PADDED tile footprints ((sublane, 128) granules).
    sub_g = 8 * max(1, 4 // itemsize)
    in_tile_bytes = bn * _round_up(tc, sub_g) * _round_up(thw, 128) * itemsize
    out_tile_bytes = _round_up(bn, sub_g) * _round_up(tc, 128) * itemsize
    scratch_bytes = 2 * _round_up(bn, 8) * _round_up(tc, 128) * 4

    def _build(num_in_buffers):
        spec_kwargs = {}
        if num_in_buffers != 2:
            spec_kwargs["pipeline_mode"] = pl.Buffered(num_in_buffers)
        vmem_limit = (num_in_buffers * in_tile_bytes + 2 * out_tile_bytes
                      + scratch_bytes + (2 << 20))
        vmem_limit = int(min(max(vmem_limit, 16 << 20), vmem_cap))
        return pl.pallas_call(
            kernel,
            out_shape=jax.ShapeDtypeStruct((nb, cb, bn, tc), x.dtype),
            grid_spec=pltpu.PrefetchScalarGridSpec(
                num_scalar_prefetch=0,
                grid=(nb, cb, hb),
                in_specs=[pl.BlockSpec((bn, tc, thw),
                                       lambda n, c, h: (n, c, h),
                                       **spec_kwargs)],
                out_specs=pl.BlockSpec((1, 1, bn, tc),
                                       lambda n, c, h: (n, c, 0, 0)),
                scratch_shapes=[
                    pltpu.VMEM((bn, tc), jnp.float32),   # running sum
                    pltpu.VMEM((bn, tc), jnp.float32),   # running max
                ],
            ),
            compiler_params=pltpu.CompilerParams(
                dimension_semantics=("parallel", "parallel", "arbitrary"),
                vmem_limit_bytes=vmem_limit,
            ),
        )

    # On v7x-class chips (short per-tile DMAs) try 3-deep input pipelining;
    # fall back to plain double buffering if the extra depth is rejected.
    if two_cores and hb >= 3:
        try:
            out_slab = _build(3)(x3)
        except Exception:
            out_slab = _build(2)(x3)
    else:
        out_slab = _build(2)(x3)

    # (nb, cb, bN, TC) -> (nb*bN, cb*TC) -> (N, C).  Lane-dense stores inside
    # the kernel; this is cheap layout plumbing on N*C elements only.
    out2 = out_slab.transpose(0, 2, 1, 3).reshape(nb * bn, cb * tc)[:N, :C]

    if flatten:
        return out2
    return out2.reshape(N, C, 1, 1)


def _reference(x, flatten: bool = False):
    axes = (2, 3)
    x_avg = jnp.mean(x, axis=axes, keepdims=not flatten)
    x_max = jnp.max(x, axis=axes, keepdims=not flatten)
    return 0.5 * x_avg + 0.5 * x_max


if __name__ == "__main__":
    key = jax.random.PRNGKey(0)

    # Primary small test (NCHW; full-dim blocks, bN batching / 2-TC split path).
    x = jax.random.normal(key, (2, 4, 16, 16), dtype=jnp.float32)
    out_keepdim = fast_adaptive_avg_max_pool(x, flatten=False)
    out_flat = fast_adaptive_avg_max_pool(x, flatten=True)
    jax.block_until_ready(out_keepdim)
    jax.block_until_ready(out_flat)
    assert out_keepdim.shape == (2, 4, 1, 1)
    assert out_flat.shape == (2, 4)
    assert jnp.allclose(out_keepdim, _reference(x, flatten=False), atol=1e-5, rtol=1e-5)
    assert jnp.allclose(out_flat, _reference(x, flatten=True), atol=1e-5, rtol=1e-5)

    # Odd, non-aligned shape (full-dim blocks, possible N-tail block).
    k1 = jax.random.PRNGKey(1)
    x_odd = jax.random.normal(k1, (3, 5, 7, 9), dtype=jnp.float32)
    out_odd = fast_adaptive_avg_max_pool(x_odd, flatten=True)
    jax.block_until_ready(out_odd)
    assert jnp.allclose(out_odd, _reference(x_odd, flatten=True), atol=1e-5, rtol=1e-5)

    # Tiny tile budget to exercise the C-tiling + HW-tiling + last-step-only
    # tail mask paths (same code paths a large CNN feature map would take).
    k2 = jax.random.PRNGKey(2)
    x_tiled = jax.random.normal(k2, (2, 16, 30, 30), dtype=jnp.float32)
    out_tiled = fast_adaptive_avg_max_pool(x_tiled, flatten=False,
                                           _target_tile_bytes=16 * 1024)
    jax.block_until_ready(out_tiled)
    assert out_tiled.shape == (2, 16, 1, 1)
    assert jnp.allclose(out_tiled, _reference(x_tiled, flatten=False),
                        atol=1e-5, rtol=1e-5)

    # bf16 input: exercises the widen-once path and the 16-row sublane granule.
    k3 = jax.random.PRNGKey(3)
    x_bf16 = jax.random.normal(k3, (2, 32, 14, 14), dtype=jnp.bfloat16)
    out_bf16 = fast_adaptive_avg_max_pool(x_bf16, flatten=True)
    jax.block_until_ready(out_bf16)
    ref_bf16 = _reference(x_bf16.astype(jnp.float32), flatten=True)
    assert jnp.allclose(out_bf16.astype(jnp.float32), ref_bf16, atol=2e-2, rtol=2e-2)

    print("KERNEL_OK")
</pallas_src>

<mosaic_0001>
module attributes {stable_mosaic.version = 11 : i64} {
  func.func @kernel(%arg0: i32, %arg1: i32, %arg2: i32, %arg3: memref<2x4x256xf32, #tpu.memory_space<vmem>>, %arg4: memref<1x1x2x4xf32, #tpu.memory_space<vmem>>, %arg5: memref<2x4xf32, #tpu.memory_space<vmem>>, %arg6: memref<2x4xf32, #tpu.memory_space<vmem>>) attributes {dimension_semantics = [#tpu.dimension_semantics<parallel>, #tpu.dimension_semantics<parallel>, #tpu.dimension_semantics<arbitrary>], iteration_bounds = array<i64: 1, 1, 1>, scalar_prefetch = 0 : i64, scratch_operands = 2 : i64, tpu.core_type = #tpu.core_type<tc>, window_params = [{transform_indices = @transform_0, window_bounds = array<i64: 2, 4, 256>}, {transform_indices = @transform_1, window_bounds = array<i64: 1, 1, 2, 4>}]} {
    %c0_i32 = arith.constant 0 : i32
    %0 = arith.cmpi eq, %arg2, %c0_i32 : i32
    %1 = arith.extui %0 : i1 to i32
    %c0_i32_0 = arith.constant 0 : i32
    %2 = arith.cmpi ne, %1, %c0_i32_0 : i32
    scf.if %2 {
      %cst_14 = arith.constant 0.000000e+00 : f32
      %15 = vector.broadcast %cst_14 : f32 to vector<2x4xf32>
      %c0_15 = arith.constant 0 : index
      %c0_16 = arith.constant 0 : index
      %16 = vector.load %arg5[%c0_15, %c0_16] : memref<2x4xf32, #tpu.memory_space<vmem>>, vector<2x4xf32>
      tpu.vector_store %arg5[%c0_15, %c0_16], %15 {strides = array<i32>} : memref<2x4xf32, #tpu.memory_space<vmem>>, vector<2x4xf32>,
      %cst_17 = arith.constant 0xFF800000 : f32
      %17 = vector.broadcast %cst_17 : f32 to vector<2x4xf32>
      %c0_18 = arith.constant 0 : index
      %c0_19 = arith.constant 0 : index
      %18 = vector.load %arg6[%c0_18, %c0_19] : memref<2x4xf32, #tpu.memory_space<vmem>>, vector<2x4xf32>
      tpu.vector_store %arg6[%c0_18, %c0_19], %17 {strides = array<i32>} : memref<2x4xf32, #tpu.memory_space<vmem>>, vector<2x4xf32>,
    } else {
    }
    %c0 = arith.constant 0 : index
    %c0_1 = arith.constant 0 : index
    %c0_2 = arith.constant 0 : index
    %3 = vector.load %arg3[%c0, %c0_1, %c0_2] : memref<2x4x256xf32, #tpu.memory_space<vmem>>, vector<2x4x256xf32>
    %c0_3 = arith.constant 0 : index
    %c0_4 = arith.constant 0 : index
    %4 = vector.load %arg5[%c0_3, %c0_4] : memref<2x4xf32, #tpu.memory_space<vmem>>, vector<2x4xf32>
    %cst = arith.constant dense<0.000000e+00> : vector<2x4xf32>
    %5 = vector.multi_reduction <add>, %3, %cst [2] : vector<2x4x256xf32> to vector<2x4xf32>
    %6 = arith.addf %4, %5 : vector<2x4xf32>
    %c0_5 = arith.constant 0 : index
    %c0_6 = arith.constant 0 : index
    %7 = vector.load %arg5[%c0_5, %c0_6] : memref<2x4xf32, #tpu.memory_space<vmem>>, vector<2x4xf32>
    tpu.vector_store %arg5[%c0_5, %c0_6], %6 {strides = array<i32>} : memref<2x4xf32, #tpu.memory_space<vmem>>, vector<2x4xf32>,
    %c0_7 = arith.constant 0 : index
    %c0_8 = arith.constant 0 : index
    %8 = vector.load %arg6[%c0_7, %c0_8] : memref<2x4xf32, #tpu.memory_space<vmem>>, vector<2x4xf32>
    %cst_9 = arith.constant dense<0xFF800000> : vector<2x4xf32>
    %9 = vector.multi_reduction <maximumf>, %3, %cst_9 [2] : vector<2x4x256xf32> to vector<2x4xf32>
    %10 = arith.maximumf %8, %9 : vector<2x4xf32>
    %c0_10 = arith.constant 0 : index
    %c0_11 = arith.constant 0 : index
    %11 = vector.load %arg6[%c0_10, %c0_11] : memref<2x4xf32, #tpu.memory_space<vmem>>, vector<2x4xf32>
    tpu.vector_store %arg6[%c0_10, %c0_11], %10 {strides = array<i32>} : memref<2x4xf32, #tpu.memory_space<vmem>>, vector<2x4xf32>,
    %c0_i32_12 = arith.constant 0 : i32
    %12 = arith.cmpi eq, %arg2, %c0_i32_12 : i32
    %13 = arith.extui %12 : i1 to i32
    %c0_i32_13 = arith.constant 0 : i32
    %14 = arith.cmpi ne, %13, %c0_i32_13 : i32
    scf.if %14 {
      %c0_14 = arith.constant 0 : index
      %c0_15 = arith.constant 0 : index
      %15 = vector.load %arg5[%c0_14, %c0_15] : memref<2x4xf32, #tpu.memory_space<vmem>>, vector<2x4xf32>
      %cst_16 = arith.constant 0.001953125 : f32
      %16 = vector.broadcast %cst_16 : f32 to vector<2x4xf32>
      %17 = arith.mulf %16, %15 : vector<2x4xf32>
      %c0_17 = arith.constant 0 : index
      %c0_18 = arith.constant 0 : index
      %18 = vector.load %arg6[%c0_17, %c0_18] : memref<2x4xf32, #tpu.memory_space<vmem>>, vector<2x4xf32>
      %cst_19 = arith.constant 5.000000e-01 : f32
      %19 = vector.broadcast %cst_19 : f32 to vector<2x4xf32>
      %20 = arith.mulf %19, %18 : vector<2x4xf32>
      %21 = arith.addf %17, %20 : vector<2x4xf32>
      %22 = vector.shape_cast %21 : vector<2x4xf32> to vector<1x1x2x4xf32>
      %c0_20 = arith.constant 0 : index
      %c0_21 = arith.constant 0 : index
      %c0_22 = arith.constant 0 : index
      %c0_23 = arith.constant 0 : index
      %23 = vector.load %arg4[%c0_20, %c0_21, %c0_22, %c0_23] : memref<1x1x2x4xf32, #tpu.memory_space<vmem>>, vector<1x1x2x4xf32>
      tpu.vector_store %arg4[%c0_20, %c0_21, %c0_22, %c0_23], %22 {strides = array<i32>} : memref<1x1x2x4xf32, #tpu.memory_space<vmem>>, vector<1x1x2x4xf32>,
    } else {
    }
    return
  }
  func.func @transform_0(%arg0: i32, %arg1: i32, %arg2: i32) -> (i32, i32, i32) {
    %c0_i32 = arith.constant 0 : i32
    return %arg0, %arg1, %arg2 : i32, i32, i32
  }
  func.func @transform_1(%arg0: i32, %arg1: i32, %arg2: i32) -> (i32, i32, i32, i32) {
    %c0_i32 = arith.constant 0 : i32
    %c0_i32_0 = arith.constant 0 : i32
    %c0_i32_1 = arith.constant 0 : i32
    return %arg0, %arg1, %c0_i32, %c0_i32_0 : i32, i32, i32, i32
  }
}

</mosaic_0001>

<bundles_post_ra>
// kernel: tpu_custom_call.1
= control target key start
LH: loop header
LB: loop body
LE: loop exit
PB: predicated region body
PF: predicated region fallthrough
CT: control target
= control target key end

     0   :  { %6 = vsyncpa [#allocation5], 0  ;;  %s218_s0 = inlined_call_operand.hbm [shape: f32[2,4,256], index: 0, kind: input, shape index: {}]   ;;  %s219_s1 = inlined_call_operand.hbm [shape: f32[1,1,2,4], index: 1, kind: output, shape index: {}]  }
   0x1   :  { %7 = vsyncpa [#allocation6], 0  ;;  %s173_s6 = smov [#allocation4]   ;;  %s125_s10 = scalar_lea.hbm %s218_s0, 256 }
   0x2   :  { %s13_s7 = sshll.u32 %s173_s6, 4  ;;  %p126_p0 = scmp.ne.s32.totalorder %s218_s0, %s125_s10  ;;  %s14_s7 = int_to_ptr.vmem [resolvable:$true] %s13_s7 }
   0x3   :  { %p129_p1 = scmp.lt.u32.totalorder %s125_s10, %s218_s0 }
   0x5   :  { %p131_p2 = pnand %p129_p1, %p126_p0 }
   0x7   :  { %134 = shalt.err (!%p131_p2)
}
   0x8   :  { %s135_s15 = scalar_lea.vmem %s14_s7, 256  ;;  %p140_p4 = scmp.lt.s32.totalorder %s14_s7, %s14_s7 }
   0x9   :  { %p136_p3 = scmp.ne.s32.totalorder %s14_s7, %s135_s15  ;;  %p141_p5 = scmp.lt.s32.totalorder %s135_s15, %s135_s15 }
   0xb   :  { %p142_p6 = por %p141_p5, %p140_p4 }
   0xd   :  { %p143_p7 = pnand %p142_p6, %p136_p3 }
   0xf   :  { %146 = shalt.err (!%p143_p7)
}
  0x10   :  { %s174_s16 = smov 128   ;;  %s175_s17 = smov 8  }
  0x11   :  { %19 = dma.hbm_to_vmem [thread:$0]  %s218_s0, 256, %s14_s7, [#allocation5], %s174_s16, %s174_s16, %s175_s17  }
  0x12   :  { %169 = dma.done.wait [#allocation5], 256  }
  0x13   :  { %170 = vsyncadd [#allocation5], 4294967040  ;;  %vm39_vm0 = vcmask 1043456   ;;  %v30_v0 = vld [vmem:[#allocation4] sm:$0xff]  ;;  %v31_v1 = vld [vmem:[#allocation4 + $0x8] sm:$0xff]  ;;  %vm27_vm1 = vcmask 25600   ;;  %v52_v18 = vlaneseq }
  0x14   :  { %v35_v2 = vcombine.high %v30_v0, %v30_v0  ;;  %v69_v3 = vsel %vm39_vm0, %v30_v0, -inf  ;;  %v40_v4 = vsel %vm39_vm0, %v30_v0, 0.0  ;;  %v36_v5 = vcombine.high %v31_v1, %v31_v1  ;;  %s178_s0 = smov [#allocation7]  }
  0x15   :  { %v74_v6 = vsel %vm39_vm0, %v31_v1, -inf  ;;  %v45_v7 = vsel %vm39_vm0, %v31_v1, 0.0  ;;  %v176_v16 = vmov -inf   ;;  %v177_v17 = vmov 0.0   ;;  %s108_s20 = sshll.u32 %s178_s0, 4  ;;  %s109_s20 = int_to_ptr.vmem [resolvable:$true] %s108_s20 }
  0x16   :  { %v70_v8 = vsel %vm39_vm0, %v35_v2, -inf  ;;  %v41_v9 = vsel %vm39_vm0, %v35_v2, 0.0  ;;  %v75_v10 = vsel %vm39_vm0, %v36_v5, -inf  ;;  %v46_v11 = vsel %vm39_vm0, %v36_v5, 0.0  ;;  %29 = vst.msk [vmem:[#allocation3] sm:$0x3] %vm27_vm1, %v176_v16  ;;  %p152_p9 = scmp.lt.s32.totalorder %s109_s20, %s109_s20 }
  0x17   :  { %v71_v12 = vmax.f32 %v69_v3, %v70_v8  ;;  %v42_v13 = vadd.f32 %v41_v9, %v40_v4  ;;  %v76_v14 = vmax.f32 %v74_v6, %v75_v10  ;;  %v47_v15 = vadd.f32 %v46_v11, %v45_v7  ;;  %28 = vst.msk [vmem:[#allocation2] sm:$0x3] %vm27_vm1, %v177_v17  ;;  %s147_s21 = scalar_lea.vmem %s109_s20, 32 }
  0x18   :  { %v53_v19 = vand.u32 127, %v52_v18  ;;  %v55_v20 = vshrl.u32 %v52_v18, 7  ;;  %vm62_vm2 = vcmask 1041409   ;;  %p148_p8 = scmp.ne.s32.totalorder %s109_s20, %s147_s21  ;;  %p153_p10 = scmp.lt.s32.totalorder %s147_s21, %s147_s21 }
  0x19   :  { %72 = vmax.xlane.f32.xlu1 %v71_v12  ;;  %43 = vadd.xlane.f32.xlu0 %v42_v13 }
  0x1a   :  { %v56_v23 = vsub.s32 %v53_v19, %v55_v20  ;;  %p154_p11 = por %p153_p10, %p152_p9 }
  0x1c   :  { %p155_p12 = pnand %p154_p11, %p148_p8 }
  0x1d   :  { %77 = vmax.xlane.f32.xlu1 %v76_v14  ;;  %48 = vadd.xlane.f32.xlu0 %v47_v15  ;;  %v68_v28 = vld [vmem:[#allocation3] sm:$0x3] }
  0x1e   :  { %v32_v30 = vld [vmem:[#allocation2] sm:$0x3] }
  0xa6   :  { %v73_v21 = vpop.xlane.xlu1 %72  ;;  %v44_v22 = vpop.xlane.xlu0 %43 }
  0xa7   :  { %v84_v26 = vrot.slane %v73_v21, %v56_v23  ;;  %v57_v27 = vrot.slane %v44_v22, %v56_v23 }
  0xaa   :  { %v78_v24 = vpop.xlane.xlu1 %77  ;;  %v49_v25 = vpop.xlane.xlu0 %48 }
  0xab   :  { %v88_v29 = vrot.slane %v78_v24, %v56_v23  ;;  %v61_v31 = vrot.slane %v49_v25, %v56_v23 }
  0xad   :  { %v89_v32 = vsel %vm62_vm2, %v88_v29, %v84_v26  ;;  %v63_v33 = vsel %vm62_vm2, %v61_v31, %v57_v27 }
  0xae   :  { %v91_v34 = vmax.f32 %v68_v28, %v89_v32  ;;  %v65_v35 = vadd.f32 %v63_v33, %v32_v30 }
  0xb0   :  { %92 = vst.msk [vmem:[#allocation3] sm:$0x3] %vm27_vm1, %v91_v34  ;;  %67 = vst.msk [vmem:[#allocation2] sm:$0x3] %vm27_vm1, %v65_v35 }
  0xb7   :  { %v96_v36 = vld [vmem:[#allocation2] sm:$0x3]  ;;  %v98_v37 = vld [vmem:[#allocation3] sm:$0x3] }
  0xb8   :  { %v97_v38 = vmul.f32 0.001953125, %v96_v36  ;;  %v99_v39 = vmul.f32 0.5, %v98_v37 }
  0xba   :  { %v100_v40 = vadd.f32 %v99_v39, %v97_v38 }
  0xbc   :  { %101 = vst.msk [vmem:[#allocation7] sm:$0x3] %vm27_vm1, %v100_v40 }
  0xbd   :  { %158 = shalt.err (!%p155_p12)
}
  0xbe   :  { %s159_s24 = scalar_lea.hbm %s219_s1, 32 }
  0xbf   :  { %p160_p13 = scmp.ne.s32.totalorder %s219_s1, %s159_s24  ;;  %p163_p0 = scmp.lt.u32.totalorder %s159_s24, %s219_s1 }
  0xc1   :  { %p165_p1 = pnand %p163_p0, %p160_p13 }
  0xc3   :  { %168 = shalt.err (!%p165_p1)
}
  0xc4   :  { %111 = dma.vmem_to_hbm [thread:$0]  %s109_s20, 32, %s219_s1, [#allocation6]  }
  0xc5   :  { %171 = dma.done.wait [#allocation6], 32  }
  0xc6   :  { %172 = vsyncadd [#allocation6], 4294967264 }
  0xc7   :  { %115 = vsyncpa [#allocation5], 1 }
  0xc8   :  { %116 = vsyncpa [#allocation6], 1 }

</bundles_post_ra>
